<compile_context>
chip_gen: v5e
topology: v5e:2x2
jax: 0.10.0
libtpu: 0.0.40
codegen_flags: <defaults>
</compile_context>

<pallas_src>
import functools

import jax
import jax.numpy as jnp
from jax.experimental import pallas as pl
from jax.experimental.pallas import tpu as pltpu


# ------------------------------- Pallas kernel -------------------------------

def _gru_rec_kernel(gxr_ref, gxz_ref, gxn_ref, whr_ref, whz_ref, whn_ref,
                    bhn_ref, out_ref, h_ref):
    """Recurrent part of one BiGRU layer, both directions fused.

    Grid: (direction d in {0 fwd, 1 bwd}  [parallel],  time-chunk c  [arbitrary]).

    gx*_ref : (TC, B, H)  precomputed input gates for this chunk (time-reversed chunk
                          order for the backward direction via the index_map)
    wh*_ref : (H, H)      hidden->gate weights (bf16), one per gate (r, z, n)
    bhn_ref : (1, H)      hidden bias of the n gate (the only one that can't be prefolded)
    out_ref : (TC, B, H)  hidden states for this chunk
    h_ref   : (2, B, H)   VMEM scratch carrying h across chunks, one slot per direction
    """
    d = pl.program_id(0)          # 0 = forward, 1 = backward
    c = pl.program_id(1)          # chunk index (already time-reversed for d == 1)
    TC, B, H = out_ref.shape

    @pl.when(c == 0)
    def _():
        h_ref[d] = jnp.zeros(h_ref.shape[1:], h_ref.dtype)

    # Hoisted loop invariants (weights + broadcast bias).
    whr = whr_ref[...]
    whz = whz_ref[...]
    whn = whn_ref[...]
    bhn = jnp.broadcast_to(bhn_ref[...], (B, H))

    def step(i, h):
        # forward: local time = i ; backward: local time = TC - 1 - i (branch-free).
        lt = i + d * (TC - 1 - 2 * i)
        h_c = h.astype(whr.dtype)                                   # f32 -> bf16 for MXU
        gh_r = jnp.dot(h_c, whr, preferred_element_type=jnp.float32)
        gh_z = jnp.dot(h_c, whz, preferred_element_type=jnp.float32)
        gh_n = jnp.dot(h_c, whn, preferred_element_type=jnp.float32)
        r = jax.nn.sigmoid(gxr_ref[lt] + gh_r)                      # gate math in f32
        z = jax.nn.sigmoid(gxz_ref[lt] + gh_z)
        n = jnp.tanh(gxn_ref[lt] + r * (gh_n + bhn))
        h_new = (1.0 - z) * n + z * h
        out_ref[lt] = h_new.astype(out_ref.dtype)
        return h_new

    h_final = jax.lax.fori_loop(0, TC, step, h_ref[d], unroll=True)
    h_ref[d] = h_final


def _bigru_layer(gxr, gxz, gxn, whr, whz, whn, bhn, *, time_chunk):
    """Run the fused bidirectional recurrence. gx*: (2, T, B, H) -> (fwd, bwd) (T, B, H)."""
    ndir, T, B, H = gxr.shape
    assert ndir == 2 and T % time_chunk == 0
    TC = time_chunk
    nc = T // TC

    def xmap(d, c):
        # forward walks chunks 0..nc-1, backward walks nc-1..0 (branch-free select).
        return (d, c + d * (nc - 1 - 2 * c), 0, 0)

    def wmap(d, c):
        return (d, 0, 0)

    grid_spec = pltpu.PrefetchScalarGridSpec(
        num_scalar_prefetch=0,
        grid=(2, nc),
        in_specs=[
            pl.BlockSpec((None, TC, B, H), xmap),   # gx_r
            pl.BlockSpec((None, TC, B, H), xmap),   # gx_z
            pl.BlockSpec((None, TC, B, H), xmap),   # gx_n
            pl.BlockSpec((None, H, H), wmap),       # W_h r   (bf16)
            pl.BlockSpec((None, H, H), wmap),       # W_h z   (bf16)
            pl.BlockSpec((None, H, H), wmap),       # W_h n   (bf16)
            pl.BlockSpec((None, 1, H), wmap),       # b_hn
        ],
        out_specs=pl.BlockSpec((None, TC, B, H), xmap),
        scratch_shapes=[pltpu.VMEM((2, B, H), jnp.float32)],
    )

    out = pl.pallas_call(
        _gru_rec_kernel,
        out_shape=jax.ShapeDtypeStruct((2, T, B, H), jnp.float32),
        grid_spec=grid_spec,
        compiler_params=pltpu.CompilerParams(
            dimension_semantics=("parallel", "arbitrary")),
    )(gxr, gxz, gxn, whr, whz, whn, bhn)
    return out[0], out[1]


# --------------------------- hoisted input projection ---------------------------

def _precompute_input_gates(parts, wi, bi, bh, compute_dtype):
    """Gx = sum_parts part @ W_i_part (+ folded biases).

    parts : list of (array, einsum_eq) producing (2, T, B, 3H) contributions.
    wi    : (2, in_dim, 3H), bi/bh: (2, 3H).
    Returns three lane-dense f32 arrays gx_r, gx_z, gx_n of shape (2, T, B, H).
    """
    wi_c = wi.astype(compute_dtype)
    H = wi.shape[-1] // 3
    gx = None
    off = 0
    for arr, eq in parts:
        fdim = arr.shape[-1]
        contrib = jnp.einsum(eq, arr.astype(compute_dtype),
                             wi_c[:, off:off + fdim, :],
                             preferred_element_type=jnp.float32)
        gx = contrib if gx is None else gx + contrib
        off += fdim
    bias_rz = (bi[:, :2 * H] + bh[:, :2 * H]).astype(jnp.float32)   # b_i + b_h prefolded
    bias_n = bi[:, 2 * H:].astype(jnp.float32)                      # n gate: b_i only
    gxr = gx[..., :H] + bias_rz[:, None, None, :H]
    gxz = gx[..., H:2 * H] + bias_rz[:, None, None, H:]
    gxn = gx[..., 2 * H:] + bias_n[:, None, None, :]
    return gxr, gxz, gxn


def _pick_time_chunk(T, cap=16):
    best = 1
    for c in range(1, min(T, cap) + 1):
        if T % c == 0:
            best = c
    return best


def bigru_forward(x_btf, params, *, time_chunk=None, compute_dtype=jnp.bfloat16):
    """BiGRU forward. x_btf: (B, T, F) -> (B, T, 2*H). Matches nn.GRU(batch_first=True,
    bidirectional=True) up to bf16 matmul precision."""
    _, T, _ = x_btf.shape
    tc = time_chunk if time_chunk is not None else _pick_time_chunk(T)
    if T % tc != 0:
        raise ValueError(f"time_chunk={tc} must divide T={T}")

    # Layer inputs kept as separate lane-dense parts (no concat / transpose HBM passes):
    # layer 0: batch-first x folded straight into the Gx einsum; later layers: fwd/bwd halves.
    parts = [(x_btf, "btf,dfg->dtbg")]
    out_f = out_b = None
    for p_fwd, p_bwd in params:
        wi = jnp.stack([p_fwd[0], p_bwd[0]])    # (2, in_dim, 3H)
        wh = jnp.stack([p_fwd[1], p_bwd[1]])    # (2, H, 3H)
        bi = jnp.stack([p_fwd[2], p_bwd[2]])    # (2, 3H)
        bh = jnp.stack([p_fwd[3], p_bwd[3]])    # (2, 3H)
        H = wh.shape[1]

        gxr, gxz, gxn = _precompute_input_gates(parts, wi, bi, bh, compute_dtype)

        whr = wh[:, :, :H].astype(compute_dtype)
        whz = wh[:, :, H:2 * H].astype(compute_dtype)
        whn = wh[:, :, 2 * H:].astype(compute_dtype)
        bhn = bh[:, 2 * H:].reshape(2, 1, H)

        out_f, out_b = _bigru_layer(gxr, gxz, gxn, whr, whz, whn, bhn, time_chunk=tc)
        parts = [(out_f, "tbh,dhg->dtbg"), (out_b, "tbh,dhg->dtbg")]

    out_tbf = jnp.concatenate([out_f, out_b], axis=-1)   # (T, B, 2H) — once, at the end
    return jnp.transpose(out_tbf, (1, 0, 2))             # (B, T, 2H)


# ---------------- pure-JAX reference (mirrors the bf16 compute dtype) ----------------

def _gru_direction_ref(x_tbf, wi, wh, bi, bh, reverse, compute_dtype):
    T, B, _ = x_tbf.shape
    H = wh.shape[0]
    xs = x_tbf[::-1] if reverse else x_tbf
    gx = jnp.einsum("tbf,fg->tbg", xs.astype(compute_dtype), wi.astype(compute_dtype),
                    preferred_element_type=jnp.float32) + bi
    wh_c = wh.astype(compute_dtype)

    def step(h, gx_t):
        gh = jnp.dot(h.astype(compute_dtype), wh_c,
                     preferred_element_type=jnp.float32) + bh
        r = jax.nn.sigmoid(gx_t[:, :H] + gh[:, :H])
        z = jax.nn.sigmoid(gx_t[:, H:2 * H] + gh[:, H:2 * H])
        n = jnp.tanh(gx_t[:, 2 * H:] + r * gh[:, 2 * H:])
        h_new = (1.0 - z) * n + z * h
        return h_new, h_new

    h0 = jnp.zeros((B, H), jnp.float32)
    _, outs = jax.lax.scan(step, h0, gx)
    return outs[::-1] if reverse else outs


def bigru_forward_ref(x_btf, params, compute_dtype=jnp.bfloat16):
    x = jnp.transpose(x_btf, (1, 0, 2))
    for p_fwd, p_bwd in params:
        out_f = _gru_direction_ref(x, *p_fwd, reverse=False, compute_dtype=compute_dtype)
        out_b = _gru_direction_ref(x, *p_bwd, reverse=True, compute_dtype=compute_dtype)
        x = jnp.concatenate([out_f, out_b], axis=-1)
    return jnp.transpose(x, (1, 0, 2))


# ---------------- deterministic parameter init (PyTorch-shaped) ----------------

def init_bigru_params(key, input_features, hidden_features, num_layers):
    """nn.GRU params per layer & direction: weight_ih (3H,in), weight_hh (3H,H),
    bias_ih (3H,), bias_hh (3H,). Stored transposed: (in,3H) / (H,3H); gate order r,z,n."""
    H = hidden_features
    bound = 1.0 / float(H) ** 0.5
    params = []
    for layer in range(num_layers):
        in_dim = input_features if layer == 0 else 2 * H
        layer_dirs = []
        for _ in range(2):
            key, k1, k2, k3, k4 = jax.random.split(key, 5)
            wi = jax.random.uniform(k1, (in_dim, 3 * H), jnp.float32, -bound, bound)
            wh = jax.random.uniform(k2, (H, 3 * H), jnp.float32, -bound, bound)
            bi = jax.random.uniform(k3, (3 * H,), jnp.float32, -bound, bound)
            bh = jax.random.uniform(k4, (3 * H,), jnp.float32, -bound, bound)
            layer_dirs.append((wi, wh, bi, bh))
        params.append(tuple(layer_dirs))
    return params


if __name__ == "__main__":
    B, T = 2, 8
    input_features, hidden_features, num_layers = 4, 32, 2

    key = jax.random.PRNGKey(0)
    key, kx = jax.random.split(key)
    x = jax.random.normal(kx, (B, T, input_features), jnp.float32)

    params = init_bigru_params(key, input_features, hidden_features, num_layers)

    # time_chunk=4 -> 2 chunks per direction: exercises the cross-chunk hidden-state carry
    # and the reversed chunk index_map of the backward direction.
    fwd = jax.jit(functools.partial(bigru_forward, time_chunk=4))
    out = jax.block_until_ready(fwd(x, params))

    ref = bigru_forward_ref(x, params)
    assert out.shape == (B, T, 2 * hidden_features), out.shape
    assert jnp.allclose(out, ref, atol=2e-3, rtol=2e-3), (
        "mismatch vs JAX reference, max abs diff = "
        f"{float(jnp.max(jnp.abs(out - ref)))}")

    print("KERNEL_OK")
</pallas_src>

<mosaic_0001>
module attributes {stable_mosaic.version = 11 : i64} {
  func.func @_gru_rec_kernel(%arg0: i32, %arg1: i32, %arg2: memref<1x4x2x32xf32, #tpu.memory_space<vmem>>, %arg3: memref<1x4x2x32xf32, #tpu.memory_space<vmem>>, %arg4: memref<1x4x2x32xf32, #tpu.memory_space<vmem>>, %arg5: memref<1x32x32xbf16, #tpu.memory_space<vmem>>, %arg6: memref<1x32x32xbf16, #tpu.memory_space<vmem>>, %arg7: memref<1x32x32xbf16, #tpu.memory_space<vmem>>, %arg8: memref<1x1x32xf32, #tpu.memory_space<vmem>>, %arg9: memref<1x4x2x32xf32, #tpu.memory_space<vmem>>, %arg10: memref<2x2x32xf32, #tpu.memory_space<vmem>>) attributes {dimension_semantics = [#tpu.dimension_semantics<parallel>, #tpu.dimension_semantics<arbitrary>], iteration_bounds = array<i64: 2, 2>, scalar_prefetch = 0 : i64, scratch_operands = 1 : i64, tpu.core_type = #tpu.core_type<tc>, window_params = [{transform_indices = @transform_0, window_bounds = array<i64: 1, 4, 2, 32>}, {transform_indices = @transform_1, window_bounds = array<i64: 1, 4, 2, 32>}, {transform_indices = @transform_2, window_bounds = array<i64: 1, 4, 2, 32>}, {transform_indices = @transform_3, window_bounds = array<i64: 1, 32, 32>}, {transform_indices = @transform_4, window_bounds = array<i64: 1, 32, 32>}, {transform_indices = @transform_5, window_bounds = array<i64: 1, 32, 32>}, {transform_indices = @transform_6, window_bounds = array<i64: 1, 1, 32>}, {transform_indices = @transform_7, window_bounds = array<i64: 1, 4, 2, 32>}]} {
    %c0_i32 = arith.constant 0 : i32
    %0 = arith.cmpi eq, %arg1, %c0_i32 : i32
    %1 = arith.extui %0 : i1 to i32
    %c0_i32_0 = arith.constant 0 : i32
    %2 = arith.cmpi ne, %1, %c0_i32_0 : i32
    scf.if %2 {
      %cst_96 = arith.constant 0.000000e+00 : f32
      %188 = vector.broadcast %cst_96 : f32 to vector<2x32xf32>
      %189 = arith.index_cast %arg0 : i32 to index
      %c0_97 = arith.constant 0 : index
      %c0_98 = arith.constant 0 : index
      %190 = vector.load %arg10[%189, %c0_97, %c0_98] : memref<2x2x32xf32, #tpu.memory_space<vmem>>, vector<1x2x32xf32>
      %191 = vector.shape_cast %190 : vector<1x2x32xf32> to vector<2x32xf32>
      %192 = vector.shape_cast %188 : vector<2x32xf32> to vector<1x2x32xf32>
      tpu.vector_store %arg10[%189, %c0_97, %c0_98], %192 {strides = array<i32>} : memref<2x2x32xf32, #tpu.memory_space<vmem>>, vector<1x2x32xf32>,
    } else {
    }
    %c0 = arith.constant 0 : index
    %c0_1 = arith.constant 0 : index
    %c0_2 = arith.constant 0 : index
    %3 = vector.load %arg5[%c0, %c0_1, %c0_2] : memref<1x32x32xbf16, #tpu.memory_space<vmem>>, vector<1x32x32xbf16>
    %4 = vector.shape_cast %3 : vector<1x32x32xbf16> to vector<32x32xbf16>
    %c0_3 = arith.constant 0 : index
    %c0_4 = arith.constant 0 : index
    %c0_5 = arith.constant 0 : index
    %5 = vector.load %arg6[%c0_3, %c0_4, %c0_5] : memref<1x32x32xbf16, #tpu.memory_space<vmem>>, vector<1x32x32xbf16>
    %6 = vector.shape_cast %5 : vector<1x32x32xbf16> to vector<32x32xbf16>
    %c0_6 = arith.constant 0 : index
    %c0_7 = arith.constant 0 : index
    %c0_8 = arith.constant 0 : index
    %7 = vector.load %arg7[%c0_6, %c0_7, %c0_8] : memref<1x32x32xbf16, #tpu.memory_space<vmem>>, vector<1x32x32xbf16>
    %8 = vector.shape_cast %7 : vector<1x32x32xbf16> to vector<32x32xbf16>
    %c0_9 = arith.constant 0 : index
    %c0_10 = arith.constant 0 : index
    %c0_11 = arith.constant 0 : index
    %9 = vector.load %arg8[%c0_9, %c0_10, %c0_11] : memref<1x1x32xf32, #tpu.memory_space<vmem>>, vector<1x1x32xf32>
    %10 = vector.shape_cast %9 : vector<1x1x32xf32> to vector<1x32xf32>
    %11 = vector.shape_cast %10 : vector<1x32xf32> to vector<1x32xf32>
    %12 = vector.broadcast %11 : vector<1x32xf32> to vector<2x32xf32>
    %13 = arith.index_cast %arg0 : i32 to index
    %c0_12 = arith.constant 0 : index
    %c0_13 = arith.constant 0 : index
    %14 = vector.load %arg10[%13, %c0_12, %c0_13] : memref<2x2x32xf32, #tpu.memory_space<vmem>>, vector<1x2x32xf32>
    %15 = vector.shape_cast %14 : vector<1x2x32xf32> to vector<2x32xf32>
    %c0_i32_14 = arith.constant 0 : i32
    %c2_i32 = arith.constant 2 : i32
    %16 = arith.muli %c2_i32, %c0_i32_14 : i32
    %c3_i32 = arith.constant 3 : i32
    %17 = arith.subi %c3_i32, %16 : i32
    %18 = arith.muli %arg0, %17 : i32
    %19 = arith.addi %c0_i32_14, %18 : i32
    %20 = arith.truncf %15 : vector<2x32xf32> to vector<2x32xbf16>
    %cst = arith.constant dense<0.000000e+00> : vector<2x32xf32>
    %21 = tpu.matmul %20, %4, %cst {dimension_numbers = #tpu.dot_dimension_numbers<[1], [0], [0], [1], [0, 0, 1, 1], [], []>} : vector<2x32xbf16>, vector<32x32xbf16>, vector<2x32xf32> -> vector<2x32xf32>
    %cst_15 = arith.constant dense<0.000000e+00> : vector<2x32xf32>
    %22 = tpu.matmul %20, %6, %cst_15 {dimension_numbers = #tpu.dot_dimension_numbers<[1], [0], [0], [1], [0, 0, 1, 1], [], []>} : vector<2x32xbf16>, vector<32x32xbf16>, vector<2x32xf32> -> vector<2x32xf32>
    %cst_16 = arith.constant dense<0.000000e+00> : vector<2x32xf32>
    %23 = tpu.matmul %20, %8, %cst_16 {dimension_numbers = #tpu.dot_dimension_numbers<[1], [0], [0], [1], [0, 0, 1, 1], [], []>} : vector<2x32xbf16>, vector<32x32xbf16>, vector<2x32xf32> -> vector<2x32xf32>
    %c0_17 = arith.constant 0 : index
    %24 = arith.index_cast %19 : i32 to index
    %c0_18 = arith.constant 0 : index
    %c0_19 = arith.constant 0 : index
    %25 = vector.load %arg2[%c0_17, %24, %c0_18, %c0_19] : memref<1x4x2x32xf32, #tpu.memory_space<vmem>>, vector<1x1x2x32xf32>
    %26 = vector.shape_cast %25 : vector<1x1x2x32xf32> to vector<2x32xf32>
    %27 = arith.addf %26, %21 : vector<2x32xf32>
    %28 = arith.negf %27 : vector<2x32xf32>
    %29 = math.exp %28 : vector<2x32xf32>
    %cst_20 = arith.constant 1.000000e+00 : f32
    %30 = vector.broadcast %cst_20 : f32 to vector<2x32xf32>
    %31 = arith.addf %30, %29 : vector<2x32xf32>
    %32 = arith.divf %30, %31 : vector<2x32xf32>
    %c0_21 = arith.constant 0 : index
    %33 = arith.index_cast %19 : i32 to index
    %c0_22 = arith.constant 0 : index
    %c0_23 = arith.constant 0 : index
    %34 = vector.load %arg3[%c0_21, %33, %c0_22, %c0_23] : memref<1x4x2x32xf32, #tpu.memory_space<vmem>>, vector<1x1x2x32xf32>
    %35 = vector.shape_cast %34 : vector<1x1x2x32xf32> to vector<2x32xf32>
    %36 = arith.addf %35, %22 : vector<2x32xf32>
    %37 = arith.negf %36 : vector<2x32xf32>
    %38 = math.exp %37 : vector<2x32xf32>
    %cst_24 = arith.constant 1.000000e+00 : f32
    %39 = vector.broadcast %cst_24 : f32 to vector<2x32xf32>
    %40 = arith.addf %39, %38 : vector<2x32xf32>
    %41 = arith.divf %39, %40 : vector<2x32xf32>
    %c0_25 = arith.constant 0 : index
    %42 = arith.index_cast %19 : i32 to index
    %c0_26 = arith.constant 0 : index
    %c0_27 = arith.constant 0 : index
    %43 = vector.load %arg4[%c0_25, %42, %c0_26, %c0_27] : memref<1x4x2x32xf32, #tpu.memory_space<vmem>>, vector<1x1x2x32xf32>
    %44 = vector.shape_cast %43 : vector<1x1x2x32xf32> to vector<2x32xf32>
    %45 = arith.addf %23, %12 : vector<2x32xf32>
    %46 = arith.mulf %32, %45 : vector<2x32xf32>
    %47 = arith.addf %44, %46 : vector<2x32xf32>
    %48 = math.tanh %47 : vector<2x32xf32>
    %cst_28 = arith.constant 1.000000e+00 : f32
    %49 = vector.broadcast %cst_28 : f32 to vector<2x32xf32>
    %50 = arith.subf %49, %41 : vector<2x32xf32>
    %51 = arith.mulf %50, %48 : vector<2x32xf32>
    %52 = arith.mulf %41, %15 : vector<2x32xf32>
    %53 = arith.addf %51, %52 : vector<2x32xf32>
    %c0_29 = arith.constant 0 : index
    %54 = arith.index_cast %19 : i32 to index
    %c0_30 = arith.constant 0 : index
    %c0_31 = arith.constant 0 : index
    %55 = vector.load %arg9[%c0_29, %54, %c0_30, %c0_31] : memref<1x4x2x32xf32, #tpu.memory_space<vmem>>, vector<1x1x2x32xf32>
    %56 = vector.shape_cast %55 : vector<1x1x2x32xf32> to vector<2x32xf32>
    %57 = vector.shape_cast %53 : vector<2x32xf32> to vector<1x1x2x32xf32>
    tpu.vector_store %arg9[%c0_29, %54, %c0_30, %c0_31], %57 {strides = array<i32>} : memref<1x4x2x32xf32, #tpu.memory_space<vmem>>, vector<1x1x2x32xf32>,
    %c1_i32 = arith.constant 1 : i32
    %c2_i32_32 = arith.constant 2 : i32
    %58 = arith.muli %c2_i32_32, %c1_i32 : i32
    %c3_i32_33 = arith.constant 3 : i32
    %59 = arith.subi %c3_i32_33, %58 : i32
    %60 = arith.muli %arg0, %59 : i32
    %61 = arith.addi %c1_i32, %60 : i32
    %62 = arith.truncf %53 : vector<2x32xf32> to vector<2x32xbf16>
    %cst_34 = arith.constant dense<0.000000e+00> : vector<2x32xf32>
    %63 = tpu.matmul %62, %4, %cst_34 {dimension_numbers = #tpu.dot_dimension_numbers<[1], [0], [0], [1], [0, 0, 1, 1], [], []>} : vector<2x32xbf16>, vector<32x32xbf16>, vector<2x32xf32> -> vector<2x32xf32>
    %cst_35 = arith.constant dense<0.000000e+00> : vector<2x32xf32>
    %64 = tpu.matmul %62, %6, %cst_35 {dimension_numbers = #tpu.dot_dimension_numbers<[1], [0], [0], [1], [0, 0, 1, 1], [], []>} : vector<2x32xbf16>, vector<32x32xbf16>, vector<2x32xf32> -> vector<2x32xf32>
    %cst_36 = arith.constant dense<0.000000e+00> : vector<2x32xf32>
    %65 = tpu.matmul %62, %8, %cst_36 {dimension_numbers = #tpu.dot_dimension_numbers<[1], [0], [0], [1], [0, 0, 1, 1], [], []>} : vector<2x32xbf16>, vector<32x32xbf16>, vector<2x32xf32> -> vector<2x32xf32>
    %c0_37 = arith.constant 0 : index
    %66 = arith.index_cast %61 : i32 to index
    %c0_38 = arith.constant 0 : index
    %c0_39 = arith.constant 0 : index
    %67 = vector.load %arg2[%c0_37, %66, %c0_38, %c0_39] : memref<1x4x2x32xf32, #tpu.memory_space<vmem>>, vector<1x1x2x32xf32>
    %68 = vector.shape_cast %67 : vector<1x1x2x32xf32> to vector<2x32xf32>
    %69 = arith.addf %68, %63 : vector<2x32xf32>
    %70 = arith.negf %69 : vector<2x32xf32>
    %71 = math.exp %70 : vector<2x32xf32>
    %cst_40 = arith.constant 1.000000e+00 : f32
    %72 = vector.broadcast %cst_40 : f32 to vector<2x32xf32>
    %73 = arith.addf %72, %71 : vector<2x32xf32>
    %74 = arith.divf %72, %73 : vector<2x32xf32>
    %c0_41 = arith.constant 0 : index
    %75 = arith.index_cast %61 : i32 to index
    %c0_42 = arith.constant 0 : index
    %c0_43 = arith.constant 0 : index
    %76 = vector.load %arg3[%c0_41, %75, %c0_42, %c0_43] : memref<1x4x2x32xf32, #tpu.memory_space<vmem>>, vector<1x1x2x32xf32>
    %77 = vector.shape_cast %76 : vector<1x1x2x32xf32> to vector<2x32xf32>
    %78 = arith.addf %77, %64 : vector<2x32xf32>
    %79 = arith.negf %78 : vector<2x32xf32>
    %80 = math.exp %79 : vector<2x32xf32>
    %cst_44 = arith.constant 1.000000e+00 : f32
    %81 = vector.broadcast %cst_44 : f32 to vector<2x32xf32>
    %82 = arith.addf %81, %80 : vector<2x32xf32>
    %83 = arith.divf %81, %82 : vector<2x32xf32>
    %c0_45 = arith.constant 0 : index
    %84 = arith.index_cast %61 : i32 to index
    %c0_46 = arith.constant 0 : index
    %c0_47 = arith.constant 0 : index
    %85 = vector.load %arg4[%c0_45, %84, %c0_46, %c0_47] : memref<1x4x2x32xf32, #tpu.memory_space<vmem>>, vector<1x1x2x32xf32>
    %86 = vector.shape_cast %85 : vector<1x1x2x32xf32> to vector<2x32xf32>
    %87 = arith.addf %65, %12 : vector<2x32xf32>
    %88 = arith.mulf %74, %87 : vector<2x32xf32>
    %89 = arith.addf %86, %88 : vector<2x32xf32>
    %90 = math.tanh %89 : vector<2x32xf32>
    %cst_48 = arith.constant 1.000000e+00 : f32
    %91 = vector.broadcast %cst_48 : f32 to vector<2x32xf32>
    %92 = arith.subf %91, %83 : vector<2x32xf32>
    %93 = arith.mulf %92, %90 : vector<2x32xf32>
    %94 = arith.mulf %83, %53 : vector<2x32xf32>
    %95 = arith.addf %93, %94 : vector<2x32xf32>
    %c0_49 = arith.constant 0 : index
    %96 = arith.index_cast %61 : i32 to index
    %c0_50 = arith.constant 0 : index
    %c0_51 = arith.constant 0 : index
    %97 = vector.load %arg9[%c0_49, %96, %c0_50, %c0_51] : memref<1x4x2x32xf32, #tpu.memory_space<vmem>>, vector<1x1x2x32xf32>
    %98 = vector.shape_cast %97 : vector<1x1x2x32xf32> to vector<2x32xf32>
    %99 = vector.shape_cast %95 : vector<2x32xf32> to vector<1x1x2x32xf32>
    tpu.vector_store %arg9[%c0_49, %96, %c0_50, %c0_51], %99 {strides = array<i32>} : memref<1x4x2x32xf32, #tpu.memory_space<vmem>>, vector<1x1x2x32xf32>,
    %c2_i32_52 = arith.constant 2 : i32
    %c2_i32_53 = arith.constant 2 : i32
    %100 = arith.muli %c2_i32_53, %c2_i32_52 : i32
    %c3_i32_54 = arith.constant 3 : i32
    %101 = arith.subi %c3_i32_54, %100 : i32
    %102 = arith.muli %arg0, %101 : i32
    %103 = arith.addi %c2_i32_52, %102 : i32
    %104 = arith.truncf %95 : vector<2x32xf32> to vector<2x32xbf16>
    %cst_55 = arith.constant dense<0.000000e+00> : vector<2x32xf32>
    %105 = tpu.matmul %104, %4, %cst_55 {dimension_numbers = #tpu.dot_dimension_numbers<[1], [0], [0], [1], [0, 0, 1, 1], [], []>} : vector<2x32xbf16>, vector<32x32xbf16>, vector<2x32xf32> -> vector<2x32xf32>
    %cst_56 = arith.constant dense<0.000000e+00> : vector<2x32xf32>
    %106 = tpu.matmul %104, %6, %cst_56 {dimension_numbers = #tpu.dot_dimension_numbers<[1], [0], [0], [1], [0, 0, 1, 1], [], []>} : vector<2x32xbf16>, vector<32x32xbf16>, vector<2x32xf32> -> vector<2x32xf32>
    %cst_57 = arith.constant dense<0.000000e+00> : vector<2x32xf32>
    %107 = tpu.matmul %104, %8, %cst_57 {dimension_numbers = #tpu.dot_dimension_numbers<[1], [0], [0], [1], [0, 0, 1, 1], [], []>} : vector<2x32xbf16>, vector<32x32xbf16>, vector<2x32xf32> -> vector<2x32xf32>
    %c0_58 = arith.constant 0 : index
    %108 = arith.index_cast %103 : i32 to index
    %c0_59 = arith.constant 0 : index
    %c0_60 = arith.constant 0 : index
    %109 = vector.load %arg2[%c0_58, %108, %c0_59, %c0_60] : memref<1x4x2x32xf32, #tpu.memory_space<vmem>>, vector<1x1x2x32xf32>
    %110 = vector.shape_cast %109 : vector<1x1x2x32xf32> to vector<2x32xf32>
    %111 = arith.addf %110, %105 : vector<2x32xf32>
    %112 = arith.negf %111 : vector<2x32xf32>
    %113 = math.exp %112 : vector<2x32xf32>
    %cst_61 = arith.constant 1.000000e+00 : f32
    %114 = vector.broadcast %cst_61 : f32 to vector<2x32xf32>
    %115 = arith.addf %114, %113 : vector<2x32xf32>
    %116 = arith.divf %114, %115 : vector<2x32xf32>
    %c0_62 = arith.constant 0 : index
    %117 = arith.index_cast %103 : i32 to index
    %c0_63 = arith.constant 0 : index
    %c0_64 = arith.constant 0 : index
    %118 = vector.load %arg3[%c0_62, %117, %c0_63, %c0_64] : memref<1x4x2x32xf32, #tpu.memory_space<vmem>>, vector<1x1x2x32xf32>
    %119 = vector.shape_cast %118 : vector<1x1x2x32xf32> to vector<2x32xf32>
    %120 = arith.addf %119, %106 : vector<2x32xf32>
    %121 = arith.negf %120 : vector<2x32xf32>
    %122 = math.exp %121 : vector<2x32xf32>
    %cst_65 = arith.constant 1.000000e+00 : f32
    %123 = vector.broadcast %cst_65 : f32 to vector<2x32xf32>
    %124 = arith.addf %123, %122 : vector<2x32xf32>
    %125 = arith.divf %123, %124 : vector<2x32xf32>
    %c0_66 = arith.constant 0 : index
    %126 = arith.index_cast %103 : i32 to index
    %c0_67 = arith.constant 0 : index
    %c0_68 = arith.constant 0 : index
    %127 = vector.load %arg4[%c0_66, %126, %c0_67, %c0_68] : memref<1x4x2x32xf32, #tpu.memory_space<vmem>>, vector<1x1x2x32xf32>
    %128 = vector.shape_cast %127 : vector<1x1x2x32xf32> to vector<2x32xf32>
    %129 = arith.addf %107, %12 : vector<2x32xf32>
    %130 = arith.mulf %116, %129 : vector<2x32xf32>
    %131 = arith.addf %128, %130 : vector<2x32xf32>
    %132 = math.tanh %131 : vector<2x32xf32>
    %cst_69 = arith.constant 1.000000e+00 : f32
    %133 = vector.broadcast %cst_69 : f32 to vector<2x32xf32>
    %134 = arith.subf %133, %125 : vector<2x32xf32>
    %135 = arith.mulf %134, %132 : vector<2x32xf32>
    %136 = arith.mulf %125, %95 : vector<2x32xf32>
    %137 = arith.addf %135, %136 : vector<2x32xf32>
    %c0_70 = arith.constant 0 : index
    %138 = arith.index_cast %103 : i32 to index
    %c0_71 = arith.constant 0 : index
    %c0_72 = arith.constant 0 : index
    %139 = vector.load %arg9[%c0_70, %138, %c0_71, %c0_72] : memref<1x4x2x32xf32, #tpu.memory_space<vmem>>, vector<1x1x2x32xf32>
    %140 = vector.shape_cast %139 : vector<1x1x2x32xf32> to vector<2x32xf32>
    %141 = vector.shape_cast %137 : vector<2x32xf32> to vector<1x1x2x32xf32>
    tpu.vector_store %arg9[%c0_70, %138, %c0_71, %c0_72], %141 {strides = array<i32>} : memref<1x4x2x32xf32, #tpu.memory_space<vmem>>, vector<1x1x2x32xf32>,
    %c3_i32_73 = arith.constant 3 : i32
    %c2_i32_74 = arith.constant 2 : i32
    %142 = arith.muli %c2_i32_74, %c3_i32_73 : i32
    %c3_i32_75 = arith.constant 3 : i32
    %143 = arith.subi %c3_i32_75, %142 : i32
    %144 = arith.muli %arg0, %143 : i32
    %145 = arith.addi %c3_i32_73, %144 : i32
    %146 = arith.truncf %137 : vector<2x32xf32> to vector<2x32xbf16>
    %cst_76 = arith.constant dense<0.000000e+00> : vector<2x32xf32>
    %147 = tpu.matmul %146, %4, %cst_76 {dimension_numbers = #tpu.dot_dimension_numbers<[1], [0], [0], [1], [0, 0, 1, 1], [], []>} : vector<2x32xbf16>, vector<32x32xbf16>, vector<2x32xf32> -> vector<2x32xf32>
    %cst_77 = arith.constant dense<0.000000e+00> : vector<2x32xf32>
    %148 = tpu.matmul %146, %6, %cst_77 {dimension_numbers = #tpu.dot_dimension_numbers<[1], [0], [0], [1], [0, 0, 1, 1], [], []>} : vector<2x32xbf16>, vector<32x32xbf16>, vector<2x32xf32> -> vector<2x32xf32>
    %cst_78 = arith.constant dense<0.000000e+00> : vector<2x32xf32>
    %149 = tpu.matmul %146, %8, %cst_78 {dimension_numbers = #tpu.dot_dimension_numbers<[1], [0], [0], [1], [0, 0, 1, 1], [], []>} : vector<2x32xbf16>, vector<32x32xbf16>, vector<2x32xf32> -> vector<2x32xf32>
    %c0_79 = arith.constant 0 : index
    %150 = arith.index_cast %145 : i32 to index
    %c0_80 = arith.constant 0 : index
    %c0_81 = arith.constant 0 : index
    %151 = vector.load %arg2[%c0_79, %150, %c0_80, %c0_81] : memref<1x4x2x32xf32, #tpu.memory_space<vmem>>, vector<1x1x2x32xf32>
    %152 = vector.shape_cast %151 : vector<1x1x2x32xf32> to vector<2x32xf32>
    %153 = arith.addf %152, %147 : vector<2x32xf32>
    %154 = arith.negf %153 : vector<2x32xf32>
    %155 = math.exp %154 : vector<2x32xf32>
    %cst_82 = arith.constant 1.000000e+00 : f32
    %156 = vector.broadcast %cst_82 : f32 to vector<2x32xf32>
    %157 = arith.addf %156, %155 : vector<2x32xf32>
    %158 = arith.divf %156, %157 : vector<2x32xf32>
    %c0_83 = arith.constant 0 : index
    %159 = arith.index_cast %145 : i32 to index
    %c0_84 = arith.constant 0 : index
    %c0_85 = arith.constant 0 : index
    %160 = vector.load %arg3[%c0_83, %159, %c0_84, %c0_85] : memref<1x4x2x32xf32, #tpu.memory_space<vmem>>, vector<1x1x2x32xf32>
    %161 = vector.shape_cast %160 : vector<1x1x2x32xf32> to vector<2x32xf32>
    %162 = arith.addf %161, %148 : vector<2x32xf32>
    %163 = arith.negf %162 : vector<2x32xf32>
    %164 = math.exp %163 : vector<2x32xf32>
    %cst_86 = arith.constant 1.000000e+00 : f32
    %165 = vector.broadcast %cst_86 : f32 to vector<2x32xf32>
    %166 = arith.addf %165, %164 : vector<2x32xf32>
    %167 = arith.divf %165, %166 : vector<2x32xf32>
    %c0_87 = arith.constant 0 : index
    %168 = arith.index_cast %145 : i32 to index
    %c0_88 = arith.constant 0 : index
    %c0_89 = arith.constant 0 : index
    %169 = vector.load %arg4[%c0_87, %168, %c0_88, %c0_89] : memref<1x4x2x32xf32, #tpu.memory_space<vmem>>, vector<1x1x2x32xf32>
    %170 = vector.shape_cast %169 : vector<1x1x2x32xf32> to vector<2x32xf32>
    %171 = arith.addf %149, %12 : vector<2x32xf32>
    %172 = arith.mulf %158, %171 : vector<2x32xf32>
    %173 = arith.addf %170, %172 : vector<2x32xf32>
    %174 = math.tanh %173 : vector<2x32xf32>
    %cst_90 = arith.constant 1.000000e+00 : f32
    %175 = vector.broadcast %cst_90 : f32 to vector<2x32xf32>
    %176 = arith.subf %175, %167 : vector<2x32xf32>
    %177 = arith.mulf %176, %174 : vector<2x32xf32>
    %178 = arith.mulf %167, %137 : vector<2x32xf32>
    %179 = arith.addf %177, %178 : vector<2x32xf32>
    %c0_91 = arith.constant 0 : index
    %180 = arith.index_cast %145 : i32 to index
    %c0_92 = arith.constant 0 : index
    %c0_93 = arith.constant 0 : index
    %181 = vector.load %arg9[%c0_91, %180, %c0_92, %c0_93] : memref<1x4x2x32xf32, #tpu.memory_space<vmem>>, vector<1x1x2x32xf32>
    %182 = vector.shape_cast %181 : vector<1x1x2x32xf32> to vector<2x32xf32>
    %183 = vector.shape_cast %179 : vector<2x32xf32> to vector<1x1x2x32xf32>
    tpu.vector_store %arg9[%c0_91, %180, %c0_92, %c0_93], %183 {strides = array<i32>} : memref<1x4x2x32xf32, #tpu.memory_space<vmem>>, vector<1x1x2x32xf32>,
    %c4_i32 = arith.constant 4 : i32
    %184 = arith.index_cast %arg0 : i32 to index
    %c0_94 = arith.constant 0 : index
    %c0_95 = arith.constant 0 : index
    %185 = vector.load %arg10[%184, %c0_94, %c0_95] : memref<2x2x32xf32, #tpu.memory_space<vmem>>, vector<1x2x32xf32>
    %186 = vector.shape_cast %185 : vector<1x2x32xf32> to vector<2x32xf32>
    %187 = vector.shape_cast %179 : vector<2x32xf32> to vector<1x2x32xf32>
    tpu.vector_store %arg10[%184, %c0_94, %c0_95], %187 {strides = array<i32>} : memref<2x2x32xf32, #tpu.memory_space<vmem>>, vector<1x2x32xf32>,
    return
  }
  func.func @transform_0(%arg0: i32, %arg1: i32) -> (i32, i32, i32, i32) {
    %c2_i32 = arith.constant 2 : i32
    %0 = arith.muli %c2_i32, %arg1 : i32
    %c1_i32 = arith.constant 1 : i32
    %1 = arith.subi %c1_i32, %0 : i32
    %2 = arith.muli %arg0, %1 : i32
    %3 = arith.addi %arg1, %2 : i32
    %c0_i32 = arith.constant 0 : i32
    %c0_i32_0 = arith.constant 0 : i32
    %c0_i32_1 = arith.constant 0 : i32
    return %arg0, %3, %c0_i32, %c0_i32_0 : i32, i32, i32, i32
  }
  func.func @transform_1(%arg0: i32, %arg1: i32) -> (i32, i32, i32, i32) {
    %c2_i32 = arith.constant 2 : i32
    %0 = arith.muli %c2_i32, %arg1 : i32
    %c1_i32 = arith.constant 1 : i32
    %1 = arith.subi %c1_i32, %0 : i32
    %2 = arith.muli %arg0, %1 : i32
    %3 = arith.addi %arg1, %2 : i32
    %c0_i32 = arith.constant 0 : i32
    %c0_i32_0 = arith.constant 0 : i32
    %c0_i32_1 = arith.constant 0 : i32
    return %arg0, %3, %c0_i32, %c0_i32_0 : i32, i32, i32, i32
  }
  func.func @transform_2(%arg0: i32, %arg1: i32) -> (i32, i32, i32, i32) {
    %c2_i32 = arith.constant 2 : i32
    %0 = arith.muli %c2_i32, %arg1 : i32
    %c1_i32 = arith.constant 1 : i32
    %1 = arith.subi %c1_i32, %0 : i32
    %2 = arith.muli %arg0, %1 : i32
    %3 = arith.addi %arg1, %2 : i32
    %c0_i32 = arith.constant 0 : i32
    %c0_i32_0 = arith.constant 0 : i32
    %c0_i32_1 = arith.constant 0 : i32
    return %arg0, %3, %c0_i32, %c0_i32_0 : i32, i32, i32, i32
  }
  func.func @transform_3(%arg0: i32, %arg1: i32) -> (i32, i32, i32) {
    %c0_i32 = arith.constant 0 : i32
    %c0_i32_0 = arith.constant 0 : i32
    %c0_i32_1 = arith.constant 0 : i32
    return %arg0, %c0_i32, %c0_i32_0 : i32, i32, i32
  }
  func.func @transform_4(%arg0: i32, %arg1: i32) -> (i32, i32, i32) {
    %c0_i32 = arith.constant 0 : i32
    %c0_i32_0 = arith.constant 0 : i32
    %c0_i32_1 = arith.constant 0 : i32
    return %arg0, %c0_i32, %c0_i32_0 : i32, i32, i32
  }
  func.func @transform_5(%arg0: i32, %arg1: i32) -> (i32, i32, i32) {
    %c0_i32 = arith.constant 0 : i32
    %c0_i32_0 = arith.constant 0 : i32
    %c0_i32_1 = arith.constant 0 : i32
    return %arg0, %c0_i32, %c0_i32_0 : i32, i32, i32
  }
  func.func @transform_6(%arg0: i32, %arg1: i32) -> (i32, i32, i32) {
    %c0_i32 = arith.constant 0 : i32
    %c0_i32_0 = arith.constant 0 : i32
    %c0_i32_1 = arith.constant 0 : i32
    return %arg0, %c0_i32, %c0_i32_0 : i32, i32, i32
  }
  func.func @transform_7(%arg0: i32, %arg1: i32) -> (i32, i32, i32, i32) {
    %c2_i32 = arith.constant 2 : i32
    %0 = arith.muli %c2_i32, %arg1 : i32
    %c1_i32 = arith.constant 1 : i32
    %1 = arith.subi %c1_i32, %0 : i32
    %2 = arith.muli %arg0, %1 : i32
    %3 = arith.addi %arg1, %2 : i32
    %c0_i32 = arith.constant 0 : i32
    %c0_i32_0 = arith.constant 0 : i32
    %c0_i32_1 = arith.constant 0 : i32
    return %arg0, %3, %c0_i32, %c0_i32_0 : i32, i32, i32, i32
  }
}

</mosaic_0001>

<bundles_post_ra>
// kernel: bigru_forward.2
= control target key start
LH: loop header
LB: loop body
LE: loop exit
PB: predicated region body
PF: predicated region fallthrough
CT: control target
= control target key end

     0   :  { %s1541_s24 = smov 0   ;;  %s1543_s25 = smov 0   ;;  %s1746_s0 = inlined_call_operand.vmem [shape: f32[2,8,2,32], index: 0, kind: input, shape index: {}]   ;;  %s1747_s1 = inlined_call_operand.vmem [shape: f32[2,8,2,32], index: 1, kind: input, shape index: {}]   ;;  %s1748_s2 = inlined_call_operand.vmem [shape: f32[2,8,2,32], index: 2, kind: input, shape index: {}]   ;;  %s1749_s3 = inlined_call_operand.vmem [shape: bf16[2,32,32], index: 3, kind: input, shape index: {}]   ;;  %s1750_s4 = inlined_call_operand.vmem [shape: bf16[2,32,32], index: 4, kind: input, shape index: {}]   ;;  %s1751_s5 = inlined_call_operand.vmem [shape: bf16[2,32,32], index: 5, kind: input, shape index: {}]   ;;  %s1752_s6 = inlined_call_operand.vmem [shape: f32[2,1,32], index: 6, kind: input, shape index: {}]   ;;  %s1753_s7 = inlined_call_operand.vmem [shape: f32[2,8,2,32], index: 7, kind: output, shape index: {}]  }
   0x1   :  { %1756 = sst [smem:[#allocation7_spill]] %s1749_s3  ;;  %s1545_s26 = smov 0  }
   0x2   :  { %1757 = sst [smem:[#allocation8_spill]] %s1750_s4  ;;  %s1547_s27 = smov 0  }
   0x3   :  { %s1549_s28 = smov 0  }
   0x4 LB: > { %1758 = sst [smem:[#allocation3_spill]] %s1490_s26  ;;  %s26_s29 = sadd.s32 1, %s1490_s26  ;;  %s1498_s28 = sphi %s1549_s28, %s17_s28   ;;  %s1494_s27 = sphi %s1547_s27, %s1767_s27   ;;  %s1490_s26 = sphi %s1545_s26, %s1766_s26   ;;  %s1486_s25 = sphi %s1543_s25, %s1765_s25   ;;  %s1482_s24 = sphi %s1541_s24, %s1764_s24  }
   0x5   : > { %1759 = sst [smem:[#allocation4_spill]] %s1494_s27  ;;  %s29_s30 = sadd.s32 1, %s1494_s27 }
   0x6   : > { %p27_p0 = scmp.ge.s32.totalorder %s26_s29, 2  ;;  %p1279_p1 = scmp.ge.s32.totalorder %s1498_s28, 1 }
   0x7   : > { %p386_p2 = scmp.lt.s32.totalorder %s1498_s28, 5 }
   0x8   : > { %s1769_s29 = smov (%p27_p0, %s26_s29), 0  ;;  %s1771_s30 = smov (!%p27_p0, %s29_s30), %s1494_s27 }
   0x9   : > { %1760 = sst [smem:[#allocation5_spill]] %s1769_s29  ;;  %p387_p3 = pnand %p1279_p1, %p386_p2 }
   0xa   : > { %p31_p4 = scmp.ge.s32.totalorder %s1771_s30, 2  ;;  %s1280_s8 = sshll.u32 (!%p387_p3), %s1482_s24, 1 }
   0xb   : > { %390 = sbr.rel (%p387_p3) target bundleno = 743 (0x2e7), region = 48  ;;  %p483_p5 = scmp.lt.s32.totalorder (!%p387_p3), %s1486_s25, 1 }
   0xc   : > { %s1773_s30 = smov (%p31_p4, %s1771_s30), 0  ;;  %s479_s9 = ssub.s32 (!%p387_p3), 1, %s1280_s8 }
   0xd   : > { %1761 = sst [smem:[#allocation6_spill]] %s1773_s30  ;;  %s480_s10 = smul.u32 (!%p387_p3), %s1486_s25, %s479_s9 }
   0xe   : > { %s1762_s3 = sld [smem:[#allocation7_spill]] (!%p387_p3)  ;;  %p1302_p7 = scmp.ne.s32.totalorder (!%p387_p3), %s1482_s24, 0 }
   0xf   : > { %s481_s12 = sadd.s32 (!%p387_p3), %s1482_s24, %s480_s10  ;;  %s1763_s4 = sld [smem:[#allocation8_spill]] (!%p387_p3) }
  0x10   : > { %s1579_s11 = scalar_select %p483_p5, %s1486_s25, 1 }
  0x11   : > { %s1281_s13 = sshll.u32 %s481_s12, 2  ;;  %s1303_s26 = sshll.u32 (!%p1302_p7), %s1486_s25, 1 }
  0x12   : > { %s1282_s14 = sshll.u32 %s1579_s11, 3  ;;  %p485_p6 = scmp.lt.s32.totalorder %s1281_s13, 7 }
  0x13   : > { %s1369_s15 = sshll.u32 %s1579_s11, 4  ;;  %s549_s10 = scalar_lea.vmem %s1752_s6, %s1579_s11 }
  0x14   : > { %s536_s18 = scalar_lea.vmem %s1762_s3, %s1369_s15  ;;  %s1775_s13 = smov (!%p485_p6, %s1281_s13), 7 }
  0x15   : > { %s541_s21 = scalar_lea.vmem %s1763_s4, %s1369_s15  ;;  %s546_s8 = scalar_lea.vmem %s1751_s5, %s1369_s15 }
  0x16   : > { %s488_s12 = sadd.s32 %s1282_s14, %s1775_s13  ;;  %572 = sbr.rel (%p1302_p7) target bundleno = 29 (0x1d), region = 52 }
  0x17   : > { %s1283_s29 = sshll.u32 %s488_s12, 1  ;;  %s574_s27 = scalar_lea.vmem (!%p1302_p7), [#allocation2], %s1303_s26 }
  0x18   : > { %s1600_s16 = scalar_lea.vmem %s1746_s0, %s1283_s29  ;;  %s1605_s19 = scalar_lea.vmem %s1747_s1, %s1283_s29 }
  0x19   : > { %s1610_s15 = scalar_lea.vmem %s1748_s2, %s1283_s29  ;;  %s1615_s13 = scalar_lea.vmem %s1753_s7, %s1283_s29 }
  0x1b   : > { %vm575_vm0 = vcmask 254976   ;;  %v1500_v0 = vmov 0.0  }
  0x1c   : > { %576 = vst.msk [vmem:[%s574_s27] sm:$0x3] %vm575_vm0, %v1500_v0 }
  0x1d PF: > { %v1373_v1 = vld [vmem:[%s536_s18 + $0x8] sm:$0xff]  ;;  %s1620_s3 = sshll.u32 %s1486_s25, 1  ;;  %v1372_v3 = vld [vmem:[%s536_s18] sm:$0xff]  ;;  %vm610_vm1 = vcmask 261120   ;;  %s1643_s24 = smul.u32 6, %s1486_s25  ;;  %vm732_vm10 = vcmask 254976  }
  0x1e   : > { %v1375_v2 = vld [vmem:[%s541_s21 + $0x8] sm:$0xff]  ;;  %620 = vmatpush.bf16.msra.mxu0 %v1373_v1  ;;  %v1374_v5 = vld [vmem:[%s541_s21] sm:$0xff]  ;;  %s594_s4 = scalar_lea.vmem [#allocation2], %s1620_s3  ;;  %745 = vmatpush.bf16.msra.mxu3 %v1373_v1  ;;  %s1156_s9 = scalar_lea.vmem %s1600_s16, %s1620_s3 }
  0x1f   : > { %v1622_v4 = vld [vmem:[%s546_s8 + $0x8] sm:$0xff]  ;;  %645 = vmatpush.bf16.msra.mxu1 %v1375_v2  ;;  %v1630_v7 = vld [vmem:[%s546_s8] sm:$0xff]  ;;  %s653_s29 = scalar_lea.vmem %s1600_s16, %s1643_s24  ;;  %s675_s14 = scalar_lea.vmem %s1605_s19, %s1643_s24 }
  0x20   : > { %717 = vmatpush.bf16.msra.mxu2 %v1622_v4  ;;  %v654_v9 = vld [vmem:[%s653_s29] sm:$0x3]  ;;  %s697_s23 = scalar_lea.vmem %s1610_s15, %s1643_s24  ;;  %s731_s11 = scalar_lea.vmem %s1615_s13, %s1643_s24  ;;  %v1338_v61 = vld [vmem:[%s1156_s9 + $0x2] sm:$0x3] }
  0x21   : > { %v676_v10 = vld [vmem:[%s675_s14] sm:$0x3]  ;;  %s1159_s8 = scalar_lea.vmem %s1605_s19, %s1620_s3  ;;  %s1165_s12 = scalar_lea.vmem %s1615_s13, %s1620_s3 }
  0x22   : > { %621 = vmatpush.bf16.msra.mxu0 %v1372_v3  ;;  %746 = vmatpush.bf16.msra.mxu3 %v1372_v3  ;;  %v1654_v29 = vld [vmem:[%s549_s10] ss:$0 sm:$0xff]  ;;  %v1341_v56 = vld [vmem:[%s1159_s8 + $0x2] sm:$0x3]  ;;  %s1162_s10 = scalar_lea.vmem %s1610_s15, %s1620_s3  ;;  %s834_s17 = ssub.s32 2, %s1486_s25 }
  0x23   : > { %v1627_v6 = vld [vmem:[%s594_s4] sm:$0x3]  ;;  %646 = vmatpush.bf16.msra.mxu1 %v1374_v5  ;;  %s1693_s20 = sshll.u32 %s834_s17, 1  ;;  %s1715_s24 = smul.u32 4294967290, %s1486_s25 }
  0x24   : > { %v597_v8 = vpack.c.bf16 %v1627_v6, %v1627_v6  ;;  %718 = vmatpush.bf16.msra.mxu2 %v1630_v7  ;;  %v698_v41 = vld [vmem:[%s697_s23] sm:$0x3]  ;;  %s866_s22 = scalar_lea.vmem %s1600_s16, %s1693_s20  ;;  %s888_s30 = scalar_lea.vmem %s1605_s19, %s1693_s20 }
  0x25   : > { %s910_s26 = scalar_lea.vmem %s1610_s15, %s1693_s20  ;;  %s932_s27 = scalar_lea.vmem %s1615_s13, %s1693_s20 }
  0x26   : > { %758 = vmatpush.bf16.msrb.mxu0 %v1375_v2  ;;  %1322 = vmatmul.msk.bf16.vlgmr.msra.gmra.mxu1 %vm610_vm1, %v597_v8  ;;  %s1177_s29 = scalar_lea.vmem %s1600_s16, %s1715_s24  ;;  %s1181_s14 = scalar_lea.vmem %s1605_s19, %s1715_s24 }
  0x27   : > { %818 = vmatpush.bf16.msrb.mxu1 %v1622_v4  ;;  %1313 = vmatmul.msk.bf16.vlgmr.msra.gmra.mxu0 %vm610_vm1, %v597_v8  ;;  %s1185_s25 = scalar_lea.vmem %s1610_s15, %s1715_s24  ;;  %s1189_s16 = scalar_lea.vmem %s1615_s13, %s1715_s24 }
  0x28   : > { %1334 = vmatmul.msk.bf16.vlgmr.msra.gmra.mxu2 %vm610_vm1, %v597_v8  ;;  %858 = vmatpush.bf16.msrb.mxu3 %v1375_v2 }
  0x29   : > { %845 = vmatpush.bf16.msrb.mxu2 %v1373_v1 }
  0x2a   : > { %759 = vmatpush.bf16.msrb.mxu0 %v1374_v5 }
  0x2b   : > { %819 = vmatpush.bf16.msrb.mxu1 %v1630_v7 }
  0x2c   : > { %859 = vmatpush.bf16.msrb.mxu3 %v1374_v5 }
  0x2d   : > { %846 = vmatpush.bf16.msrb.mxu2 %v1372_v3 }
  0x2e   : > { %918 = vmatpush.bf16.msra.mxu0 %v1622_v4 }
  0x2f   : > { %946 = vmatpush.bf16.msra.mxu1 %v1373_v1 }
  0x31   : > { %959 = vmatpush.bf16.msra.mxu2 %v1375_v2 }
  0x32   : > { %919 = vmatpush.bf16.msra.mxu0 %v1630_v7 }
  0x33   : > { %947 = vmatpush.bf16.msra.mxu1 %v1372_v3 }
  0x35   : > { %960 = vmatpush.bf16.msra.mxu2 %v1374_v5 }
  0xa3   : > { %v648_v12 = vpop.f32.mrf.mxu1 }
  0xa4   : > { %v623_v11 = vpop.f32.mrf.mxu0  ;;  %v677_v14 = vadd.f32 %v676_v10, %v648_v12 }
  0xa5   : > { %v655_v13 = vadd.f32 %v654_v9, %v623_v11 }
  0xa6   : > { %v1325_v16 = vmul.f32 -1.442695, %v677_v14 }
  0xa7   : > { %v1324_v15 = vmul.f32 -1.442695, %v655_v13 }
  0xa9   : > { %1420 = vpow2.f32 %v1324_v15 }
  0xaa   : > { %1422 = vpow2.f32 %v1325_v16 }
  0xab   : > { %v720_v17 = vpop.f32.mrf.mxu2  ;;  %v650_v19 = vpop.f32.mrf.mxu1 }
  0xac   : > { %v625_v18 = vpop.f32.mrf.mxu0  ;;  %v721_v37 = vadd.f32 %v1654_v29, %v720_v17 }
  0xaf   : > { %v1421_v20 = vpop.eup %1420 }
  0xb0   : > { %v1423_v21 = vpop.eup %1422  ;;  %v659_v22 = vadd.f32 1.0, %v1421_v20 }
  0xb1   : > { %v681_v23 = vadd.f32 1.0, %v1423_v21 }
  0xb2   : > { %1424 = vrcp.f32 %v659_v22  ;;  %v671_v32 = vand.u32 2147483648, %v659_v22  ;;  %v669_v34 = vand.u32 2147483647, %v659_v22  ;;  %vm665_vm3 = vweird.f32 %v659_v22 }
  0xb3   : > { %1426 = vrcp.f32 %v681_v23  ;;  %v722_v24 = vpop.f32.mrf.mxu2  ;;  %vm687_vm6 = vweird.f32 %v681_v23  ;;  %v693_v43 = vand.u32 2147483648, %v681_v23  ;;  %v691_v45 = vand.u32 2147483647, %v681_v23 }
  0xb4   : > { %v672_v38 = vor.u32 1.1754944e-38, %v671_v32  ;;  %vm670_vm5 = vcmp.eq.f32.partialorder %v669_v34, 8.507059e+37 }
  0xb5   : > { %v694_v48 = vor.u32 1.1754944e-38, %v693_v43  ;;  %vm692_vm9 = vcmp.eq.f32.partialorder %v691_v45, 8.507059e+37 }
  0xb8   : > { %v1425_v25 = vpop.eup %1424 }
  0xb9   : > { %v1427_v26 = vpop.eup %1426  ;;  %v661_v27 = vmul.f32 %v1425_v25, %v659_v22  ;;  %vm666_vm2 = vweird.f32 %v1425_v25  ;;  %v1344_v22 = vld [vmem:[%s1162_s10 + $0x2] sm:$0x3] }
  0xba   : > { %v683_v28 = vmul.f32 %v1427_v26, %v681_v23  ;;  %vm667_vm4 = vmor %vm665_vm3, %vm666_vm2  ;;  %vm688_vm7 = vweird.f32 %v1427_v26 }
  0xbb   : > { %v662_v30 = vsub.f32 1.0, %v661_v27  ;;  %vm689_vm8 = vmor %vm687_vm6, %vm688_vm7 }
  0xbc   : > { %v684_v31 = vsub.f32 1.0, %v683_v28 }
  0xbd   : > { %v663_v33 = vmul.f32 %v1425_v25, %v662_v30 }
  0xbe   : > { %v685_v35 = vmul.f32 %v1427_v26, %v684_v31 }
  0xbf   : > { %v664_v36 = vadd.f32 %v1425_v25, %v663_v33 }
  0xc0   : > { %v686_v42 = vadd.f32 %v1427_v26, %v685_v35 }
  0xc1   : > { %v668_v39 = vsel %vm667_vm4, %v1425_v25, %v664_v36 }
  0xc2   : > { %v673_v40 = vsel %vm670_vm5, %v672_v38, %v668_v39  ;;  %v690_v47 = vsel %vm689_vm8, %v1427_v26, %v686_v42 }
  0xc3   : > { %v724_v44 = vmul.f32 %v721_v37, %v673_v40  ;;  %v695_v49 = vsel %vm692_vm9, %v694_v48, %v690_v47  ;;  %v867_v40 = vld [vmem:[%s866_s22] sm:$0x3] }
  0xc4   : > { %v727_v50 = vsub.f32 1.0, %v695_v49  ;;  %v729_v53 = vmul.f32 %v695_v49, %v1627_v6 }
  0xc5   : > { %v725_v46 = vadd.f32 %v724_v44, %v698_v41  ;;  %v889_v41 = vld [vmem:[%s888_s30] sm:$0x3] }
  0xc7   : > { %1428 = vtanh.f32 %v725_v46 }
  0xcd   : > { %v1429_v51 = vpop.eup %1428 }
  0xce   : > { %v728_v52 = vmul.f32 %v1429_v51, %v727_v50 }
  0xd0   : > { %v1662_v54 = vadd.f32 %v729_v53, %v728_v52 }
  0xd2   : > { %733 = vst.msk [vmem:[%s731_s11] sm:$0x3] %vm732_vm10, %v1662_v54  ;;  %v735_v55 = vpack.c.bf16 %v1662_v54, %v1662_v54 }
  0xd4   : > { %1335 = vmatmul.msk.bf16.vlgmr.msra.gmra.mxu3 %vm610_vm1, %v735_v55  ;;  %1336 = vmatmul.msk.bf16.vlgmr.msrb.gmra.mxu0 %vm610_vm1, %v735_v55 }
  0xd5   : > { %1345 = vmatmul.msk.bf16.vlgmr.msrb.gmra.mxu1 %vm610_vm1, %v735_v55  ;;  %1019 = vmatpush.bf16.msra.mxu3 %v1622_v4 }
  0xd9   : > { %1020 = vmatpush.bf16.msra.mxu3 %v1630_v7 }
 0x151   : > { %v761_v57 = vpop.f32.mrf.mxu0 }
 0x152   : > { %v790_v58 = vadd.f32 %v1341_v56, %v761_v57  ;;  %v821_v59 = vpop.f32.mrf.mxu1 }
 0x153   : > { %v822_v20 = vadd.f32 %v1654_v29, %v821_v59 }
 0x154   : > { %v1342_v60 = vmul.f32 -1.442695, %v790_v58 }
 0x156   : > { %1430 = vpow2.f32 %v1342_v60 }
 0x157   : > { %v748_v62 = vpop.f32.mrf.mxu3 }
 0x158   : > { %v768_v63 = vadd.f32 %v1338_v61, %v748_v62 }
 0x159   : > { %v763_v0 = vpop.f32.mrf.mxu0 }
 0x15a   : > { %v1339_v1 = vmul.f32 -1.442695, %v768_v63  ;;  %v823_v2 = vpop.f32.mrf.mxu1 }
 0x15c   : > { %v1431_v3 = vpop.eup %1430  ;;  %1432 = vpow2.f32 %v1339_v1 }
 0x15d   : > { %v794_v5 = vadd.f32 1.0, %v1431_v3 }
 0x15f   : > { %v750_v4 = vpop.f32.mrf.mxu3  ;;  %1434 = vrcp.f32 %v794_v5  ;;  %v806_v25 = vand.u32 2147483648, %v794_v5  ;;  %vm800_vm0 = vweird.f32 %v794_v5  ;;  %v804_v27 = vand.u32 2147483647, %v794_v5 }
 0x161   : > { %v807_v31 = vor.u32 1.1754944e-38, %v806_v25  ;;  %vm805_vm3 = vcmp.eq.f32.partialorder %v804_v27, 8.507059e+37  ;;  %v1360_v25 = vld [vmem:[%s1181_s14 + $0x6] sm:$0x3] }
 0x162   : > { %v1433_v6 = vpop.eup %1432 }
 0x163   : > { %v772_v7 = vadd.f32 1.0, %v1433_v6  ;;  %v911_v6 = vld [vmem:[%s910_s26] sm:$0x3] }
 0x165   : > { %1436 = vrcp.f32 %v772_v7  ;;  %v1435_v8 = vpop.eup %1434  ;;  %v784_v14 = vand.u32 2147483648, %v772_v7  ;;  %v782_v16 = vand.u32 2147483647, %v772_v7  ;;  %vm778_vm12 = vweird.f32 %v772_v7 }
 0x166   : > { %v796_v9 = vmul.f32 %v1435_v8, %v794_v5  ;;  %vm801_vm15 = vweird.f32 %v1435_v8 }
 0x167   : > { %v785_v19 = vor.u32 1.1754944e-38, %v784_v14  ;;  %vm783_vm14 = vcmp.eq.f32.partialorder %v782_v16, 8.507059e+37  ;;  %vm802_vm2 = vmor %vm800_vm0, %vm801_vm15 }
 0x168   : > { %v797_v12 = vsub.f32 1.0, %v796_v9 }
 0x16a   : > { %v798_v17 = vmul.f32 %v1435_v8, %v797_v12 }
 0x16b   : > { %v1437_v10 = vpop.eup %1436 }
 0x16c   : > { %v774_v11 = vmul.f32 %v1437_v10, %v772_v7  ;;  %vm779_vm11 = vweird.f32 %v1437_v10  ;;  %v799_v23 = vadd.f32 %v1435_v8, %v798_v17 }
 0x16d   : > { %vm780_vm13 = vmor %vm778_vm12, %vm779_vm11 }
 0x16e   : > { %v775_v13 = vsub.f32 1.0, %v774_v11  ;;  %v803_v30 = vsel %vm802_vm2, %v1435_v8, %v799_v23 }
 0x16f   : > { %v808_v32 = vsel %vm805_vm3, %v807_v31, %v803_v30 }
 0x170   : > { %v776_v15 = vmul.f32 %v1437_v10, %v775_v13  ;;  %v828_v33 = vsub.f32 1.0, %v808_v32  ;;  %v830_v36 = vmul.f32 %v808_v32, %v1662_v54 }
 0x172   : > { %v777_v18 = vadd.f32 %v1437_v10, %v776_v15 }
 0x174   : > { %v781_v21 = vsel %vm780_vm13, %v1437_v10, %v777_v18 }
 0x175   : > { %v786_v24 = vsel %vm783_vm14, %v785_v19, %v781_v21  ;;  %v1357_v21 = vld [vmem:[%s1177_s29 + $0x6] sm:$0x3] }
 0x176   : > { %v825_v26 = vmul.f32 %v822_v20, %v786_v24 }
 0x178   : > { %v826_v28 = vadd.f32 %v1344_v22, %v825_v26 }
 0x17a   : > { %1438 = vtanh.f32 %v826_v28 }
 0x180   : > { %v1439_v34 = vpop.eup %1438 }
 0x181   : > { %v829_v35 = vmul.f32 %v1439_v34, %v828_v33 }
 0x183   : > { %v1683_v37 = vadd.f32 %v830_v36, %v829_v35 }
 0x185   : > { %1347 = vst.msk [vmem:[%s1165_s12 + $0x2] sm:$0x3] %vm732_vm10, %v1683_v37  ;;  %v835_v38 = vpack.c.bf16 %v1683_v37, %v1683_v37 }
 0x187   : > { %1348 = vmatmul.msk.bf16.vlgmr.msrb.gmra.mxu2 %vm610_vm1, %v835_v38  ;;  %1349 = vmatmul.msk.bf16.vlgmr.msrb.gmra.mxu3 %vm610_vm1, %v835_v38 }
 0x188   : > { %1353 = vmatmul.msk.bf16.vlgmr.msra.gmra.mxu0 %vm610_vm1, %v835_v38 }
 0x205   : > { %v921_v39 = vpop.f32.mrf.mxu0 }
 0x206   : > { %v922_v3 = vadd.f32 %v1654_v29, %v921_v39 }
 0x20a   : > { %v848_v42 = vpop.f32.mrf.mxu2  ;;  %v861_v43 = vpop.f32.mrf.mxu3 }
 0x20b   : > { %v868_v44 = vadd.f32 %v867_v40, %v848_v42  ;;  %v890_v45 = vadd.f32 %v889_v41, %v861_v43 }
 0x20d   : > { %v1351_v46 = vmul.f32 -1.442695, %v868_v44  ;;  %v1352_v47 = vmul.f32 -1.442695, %v890_v45  ;;  %v923_v48 = vpop.f32.mrf.mxu0 }
 0x20f   : > { %1440 = vpow2.f32 %v1351_v46 }
 0x210   : > { %1442 = vpow2.f32 %v1352_v47 }
 0x212   : > { %v850_v49 = vpop.f32.mrf.mxu2  ;;  %v863_v50 = vpop.f32.mrf.mxu3 }
 0x215   : > { %v1441_v51 = vpop.eup %1440 }
 0x216   : > { %v1443_v52 = vpop.eup %1442  ;;  %v872_v53 = vadd.f32 1.0, %v1441_v51 }
 0x217   : > { %v894_v54 = vadd.f32 1.0, %v1443_v52  ;;  %v1363_v52 = vld [vmem:[%s1185_s25 + $0x6] sm:$0x3] }
 0x218   : > { %1444 = vrcp.f32 %v872_v53  ;;  %v884_v60 = vand.u32 2147483648, %v872_v53  ;;  %v882_v63 = vand.u32 2147483647, %v872_v53  ;;  %vm878_vm5 = vweird.f32 %v872_v53 }
 0x219   : > { %1446 = vrcp.f32 %v894_v54  ;;  %v906_v9 = vand.u32 2147483648, %v894_v54  ;;  %vm900_vm9 = vweird.f32 %v894_v54  ;;  %v904_v10 = vand.u32 2147483647, %v894_v54 }
 0x21a   : > { %v885_v2 = vor.u32 1.1754944e-38, %v884_v60  ;;  %vm883_vm7 = vcmp.eq.f32.partialorder %v882_v63, 8.507059e+37 }
 0x21b   : > { %v907_v13 = vor.u32 1.1754944e-38, %v906_v9  ;;  %vm905_vm12 = vcmp.eq.f32.partialorder %v904_v10, 8.507059e+37 }
 0x21e   : > { %v1445_v55 = vpop.eup %1444 }
 0x21f   : > { %v1447_v56 = vpop.eup %1446  ;;  %v874_v57 = vmul.f32 %v1445_v55, %v872_v53  ;;  %vm879_vm4 = vweird.f32 %v1445_v55 }
 0x220   : > { %v896_v58 = vmul.f32 %v1447_v56, %v894_v54  ;;  %vm880_vm6 = vmor %vm878_vm5, %vm879_vm4  ;;  %vm901_vm8 = vweird.f32 %v1447_v56 }
 0x221   : > { %v875_v59 = vsub.f32 1.0, %v874_v57  ;;  %vm902_vm11 = vmor %vm900_vm9, %vm901_vm8 }
 0x222   : > { %v897_v61 = vsub.f32 1.0, %v896_v58 }
 0x223   : > { %v876_v62 = vmul.f32 %v1445_v55, %v875_v59 }
 0x224   : > { %v898_v0 = vmul.f32 %v1447_v56, %v897_v61 }
 0x225   : > { %v877_v1 = vadd.f32 %v1445_v55, %v876_v62 }
 0x226   : > { %v899_v7 = vadd.f32 %v1447_v56, %v898_v0 }
 0x227   : > { %v881_v5 = vsel %vm880_vm6, %v1445_v55, %v877_v1 }
 0x228   : > { %v886_v4 = vsel %vm883_vm7, %v885_v2, %v881_v5  ;;  %v903_v12 = vsel %vm902_vm11, %v1447_v56, %v899_v7 }
 0x229   : > { %v925_v8 = vmul.f32 %v922_v3, %v886_v4  ;;  %v908_v14 = vsel %vm905_vm12, %v907_v13, %v903_v12 }
 0x22a   : > { %v928_v15 = vsub.f32 1.0, %v908_v14  ;;  %v930_v18 = vmul.f32 %v908_v14, %v1683_v37 }
 0x22b   : > { %v926_v11 = vadd.f32 %v925_v8, %v911_v6 }
 0x22d   : > { %1448 = vtanh.f32 %v926_v11 }
 0x233   : > { %v1449_v16 = vpop.eup %1448 }
 0x234   : > { %v929_v17 = vmul.f32 %v1449_v16, %v928_v15 }
 0x236   : > { %v1705_v19 = vadd.f32 %v930_v18, %v929_v17 }
 0x238   : > { %933 = vst.msk [vmem:[%s932_s27] sm:$0x3] %vm732_vm10, %v1705_v19  ;;  %v936_v20 = vpack.c.bf16 %v1705_v19, %v1705_v19 }
 0x23a   : > { %1354 = vmatmul.msk.bf16.vlgmr.msra.gmra.mxu1 %vm610_vm1, %v936_v20  ;;  %1355 = vmatmul.msk.bf16.vlgmr.msra.gmra.mxu2 %vm610_vm1, %v936_v20 }
 0x23b   : > { %1364 = vmatmul.msk.bf16.vlgmr.msra.gmra.mxu3 %vm610_vm1, %v936_v20 }
 0x2b7   : > { %v949_v22 = vpop.f32.mrf.mxu1 }
 0x2b8   : > { %v969_v23 = vadd.f32 %v1357_v21, %v949_v22 }
 0x2ba   : > { %v1358_v24 = vmul.f32 -1.442695, %v969_v23 }
 0x2bc   : > { %1450 = vpow2.f32 %v1358_v24 }
 0x2bd   : > { %v962_v26 = vpop.f32.mrf.mxu2 }
 0x2be   : > { %v991_v27 = vadd.f32 %v1360_v25, %v962_v26  ;;  %v1022_v28 = vpop.f32.mrf.mxu3 }
 0x2bf   : > { %v951_v30 = vpop.f32.mrf.mxu1  ;;  %v1023_v50 = vadd.f32 %v1654_v29, %v1022_v28 }
 0x2c0   : > { %v1361_v31 = vmul.f32 -1.442695, %v991_v27 }
 0x2c2   : > { %v1451_v32 = vpop.eup %1450  ;;  %1452 = vpow2.f32 %v1361_v31 }
 0x2c3   : > { %v973_v33 = vadd.f32 1.0, %v1451_v32 }
 0x2c5   : > { %1454 = vrcp.f32 %v973_v33  ;;  %v964_v34 = vpop.f32.mrf.mxu2  ;;  %v985_v41 = vand.u32 2147483648, %v973_v33  ;;  %v983_v43 = vand.u32 2147483647, %v973_v33  ;;  %vm979_vm13 = vweird.f32 %v973_v33 }
 0x2c6   : > { %v1024_v35 = vpop.f32.mrf.mxu3 }
 0x2c7   : > { %v986_v47 = vor.u32 1.1754944e-38, %v985_v41  ;;  %vm984_vm15 = vcmp.eq.f32.partialorder %v983_v43, 8.507059e+37 }
 0x2c8   : > { %v1453_v36 = vpop.eup %1452 }
 0x2c9   : > { %v995_v37 = vadd.f32 1.0, %v1453_v36 }
 0x2cb   : > { %v1455_v38 = vpop.eup %1454  ;;  %1456 = vrcp.f32 %v995_v37  ;;  %v1007_v54 = vand.u32 2147483648, %v995_v37  ;;  %v1005_v56 = vand.u32 2147483647, %v995_v37  ;;  %vm1001_vm2 = vweird.f32 %v995_v37 }
 0x2cc   : > { %v975_v39 = vmul.f32 %v1455_v38, %v973_v33  ;;  %vm980_vm1 = vweird.f32 %v1455_v38 }
 0x2cd   : > { %vm981_vm14 = vmor %vm979_vm13, %vm980_vm1  ;;  %v1008_v59 = vor.u32 1.1754944e-38, %v1007_v54  ;;  %vm1006_vm4 = vcmp.eq.f32.partialorder %v1005_v56, 8.507059e+37 }
 0x2ce   : > { %v976_v40 = vsub.f32 1.0, %v975_v39 }
 0x2d0   : > { %v977_v42 = vmul.f32 %v1455_v38, %v976_v40 }
 0x2d1   : > { %v1457_v44 = vpop.eup %1456 }
 0x2d2   : > { %v997_v45 = vmul.f32 %v1457_v44, %v995_v37  ;;  %v978_v46 = vadd.f32 %v1455_v38, %v977_v42  ;;  %vm1002_vm0 = vweird.f32 %v1457_v44 }
 0x2d3   : > { %vm1003_vm3 = vmor %vm1001_vm2, %vm1002_vm0 }
 0x2d4   : > { %v998_v48 = vsub.f32 1.0, %v997_v45  ;;  %v982_v49 = vsel %vm981_vm14, %v1455_v38, %v978_v46 }
 0x2d5   : > { %v987_v51 = vsel %vm984_vm15, %v986_v47, %v982_v49 }
 0x2d6   : > { %v999_v53 = vmul.f32 %v1457_v44, %v998_v48  ;;  %v1026_v55 = vmul.f32 %v1023_v50, %v987_v51 }
 0x2d8   : > { %v1000_v57 = vadd.f32 %v1457_v44, %v999_v53  ;;  %v1027_v58 = vadd.f32 %v1363_v52, %v1026_v55 }
 0x2da   : > { %v1004_v60 = vsel %vm1003_vm3, %v1457_v44, %v1000_v57  ;;  %1458 = vtanh.f32 %v1027_v58 }
 0x2db   : > { %v1009_v61 = vsel %vm1006_vm4, %v1008_v59, %v1004_v60 }
 0x2dc   : > { %v1029_v29 = vsub.f32 1.0, %v1009_v61  ;;  %v1031_v0 = vmul.f32 %v1009_v61, %v1705_v19 }
 0x2e0   : > { %v1459_v62 = vpop.eup %1458 }
 0x2e1   : > { %v1030_v63 = vmul.f32 %v1459_v62, %v1029_v29 }
 0x2e3   : > { %v1032_v1 = vadd.f32 %v1031_v0, %v1030_v63 }
 0x2e5   : > { %1366 = vst.msk [vmem:[%s1189_s16 + $0x6] sm:$0x3] %vm732_vm10, %v1032_v1 }
 0x2e6   : > { %1035 = vst.msk [vmem:[%s594_s4] sm:$0x3] %vm732_vm10, %v1032_v1 }
 0x2e7 PF: > { %s17_s28 = sadd.s32 1, %s1498_s28   ;;  %s1764_s24 = sld [smem:[#allocation3_spill]] }
 0x2e8   : > { %p14_p8 = scmp.ge.s32.totalorder %s17_s28, 6   ;;  %s1765_s25 = sld [smem:[#allocation4_spill]] }
 0x2e9   : > { %s1766_s26 = sld [smem:[#allocation5_spill]] }
 0x2ea   : > { %s1767_s27 = sld [smem:[#allocation6_spill]]  ;;  %16 = sbr.rel (!%p14_p8) target bundleno = 4 (0x4), region = 118 }

</bundles_post_ra>
